<compile_context>
chip_gen: v7x
topology: tpu7x:2x2x1
jax: 0.10.0
libtpu: 0.0.40
codegen_flags: <defaults>
</compile_context>

<pallas_src>
from functools import partial

import jax
import jax.numpy as jnp
from jax.experimental import pallas as pl
from jax.experimental.pallas import tpu as pltpu


def _round_up(x, m):
    return ((x + m - 1) // m) * m


def _qkv_kernel(x_ref, w_ref, b_ref, qkv_ref):
    # x_ref:   (tm, C)   bf16 token tile (streamed per grid step)
    # w_ref:   (C, C3)   bf16 full qkv weight (constant block -> VMEM resident)
    # b_ref:   (1, C3)   f32 qkv bias (constant block -> VMEM resident)
    # qkv_ref: (tm, C3)  projected qkv tile (output dtype of the module input)
    acc = jnp.dot(x_ref[...], w_ref[...], preferred_element_type=jnp.float32)
    qkv_ref[...] = (acc + b_ref[...]).astype(qkv_ref.dtype)


def _qkv_projection(x2d, w_qkv, b2d, tm, out_dtype):
    """(N, C) @ (C, 3C) + bias, 1-D row grid, weight/bias resident in VMEM."""
    N, C = x2d.shape
    C3 = w_qkv.shape[1]
    assert N % tm == 0

    flops = 2 * N * C * C3
    bytes_accessed = (
        N * C * x2d.dtype.itemsize          # x read once
        + C * C3 * w_qkv.dtype.itemsize     # W read once (resident across rows)
        + C3 * b2d.dtype.itemsize           # bias read once
        + N * C3 * jnp.dtype(out_dtype).itemsize)  # qkv written once

    return pl.pallas_call(
        _qkv_kernel,
        out_shape=jax.ShapeDtypeStruct((N, C3), out_dtype),
        grid_spec=pltpu.PrefetchScalarGridSpec(
            num_scalar_prefetch=0,
            grid=(N // tm,),
            in_specs=[
                pl.BlockSpec((tm, C), lambda i: (i, 0)),   # x rows (streamed)
                pl.BlockSpec((C, C3), lambda i: (0, 0)),   # W: constant -> fetched once
                pl.BlockSpec((1, C3), lambda i: (0, 0)),   # bias: constant -> fetched once
            ],
            out_specs=pl.BlockSpec((tm, C3), lambda i: (i, 0)),
        ),
        compiler_params=pltpu.CompilerParams(
            # Rows are independent -> megacore shards the row axis; both TCs
            # reuse the same small resident W.
            dimension_semantics=("parallel",),
        ),
        cost_estimate=pl.CostEstimate(
            flops=flops, transcendentals=0, bytes_accessed=bytes_accessed),
    )(x2d, w_qkv, b2d)


@partial(jax.jit, static_argnames=("num_heads", "tm"))
def bi_level_routing_attention(x, w_qkv, b_qkv, num_heads, tm=512):
    """Forward of BiLevelRoutingAttention (as written in the reference source).

    x:      (B, H, W, C)
    w_qkv:  (C, 3C)  qkv weight laid out so that y = x @ w_qkv
    b_qkv:  (3C,)    qkv bias
    Returns (out, qkv) where out == x (the module's return value) and qkv is
    the packed (B*H*W, 3C) projection the module computes (and then discards).
    Per-head q/k/v can be obtained by slicing/reshaping qkv lazily; no
    HBM-churning (2,0,3,1,4) transpose is materialized here.
    """
    B, H, W, C = x.shape
    N = B * H * W
    C3 = w_qkv.shape[1]
    assert C3 == 3 * C
    assert C % num_heads == 0

    x2d = x.reshape(N, C)

    # bf16 operands for the MXU; accumulation stays f32 inside the kernel.
    x_bf16 = x2d.astype(jnp.bfloat16)
    w_bf16 = w_qkv.astype(jnp.bfloat16)
    b2d = b_qkv.reshape(1, C3).astype(jnp.float32)

    # Row tile: multiple of 8 sublanes, no larger than the (padded) row count.
    tm_eff = min(tm, _round_up(N, 8))
    n_pad = _round_up(N, tm_eff)
    if n_pad != N:
        # Handles non-divisible stages (e.g. 7x7 spatial grids). Padded rows
        # produce garbage qkv rows that are sliced off below.
        x_bf16 = jnp.pad(x_bf16, ((0, n_pad - N), (0, 0)))

    qkv = _qkv_projection(x_bf16, w_bf16, b2d, tm_eff, x.dtype)
    if n_pad != N:
        qkv = qkv[:N]

    # Module semantics: the forward returns the input x untouched. No kernel
    # passthrough copy — x is returned directly (zero extra HBM traffic).
    return x, qkv


if __name__ == "__main__":
    # Module hyperparameters (dim divisible by num_heads; C and 3C multiples of
    # 128 so kernel tiles are lane-dense even at demo size).
    dim = 128
    num_heads = 8
    n_win = 7   # unused in forward
    topk = 4    # unused in forward

    key = jax.random.PRNGKey(0)
    kx, kw, kb = jax.random.split(key, 3)

    B, H, W, C = 2, 8, 8, dim
    x = jax.random.normal(kx, (B, H, W, C), dtype=jnp.float32)
    # PyTorch Linear weight is (out, in); we store its transpose (in, out).
    w_qkv = (jax.random.normal(kw, (C, 3 * C), dtype=jnp.float32)
             * (1.0 / jnp.sqrt(C)))
    b_qkv = jax.random.normal(kb, (3 * C,), dtype=jnp.float32) * 0.01

    out, qkv = bi_level_routing_attention(x, w_qkv, b_qkv, num_heads)
    out = jax.block_until_ready(out)
    qkv = jax.block_until_ready(qkv)

    # Forward semantics: output is exactly the input x.
    assert out.shape == x.shape
    assert jnp.array_equal(out, x)

    # Sanity-check the qkv projection against a bf16-input / f32-accumulate
    # reference (matches the kernel's MXU numerics).
    x_ref = x.reshape(-1, C).astype(jnp.bfloat16).astype(jnp.float32)
    w_ref = w_qkv.astype(jnp.bfloat16).astype(jnp.float32)
    qkv_ref = (jnp.dot(x_ref, w_ref, precision=jax.lax.Precision.HIGHEST)
               + b_qkv)
    assert qkv.shape == qkv_ref.shape
    assert jnp.allclose(qkv, qkv_ref, atol=2e-2, rtol=2e-2)

    # Lazy per-head q/k/v split (what the module computes then discards) —
    # cheap slices/reshapes only, no full-tensor (2,0,3,1,4) transpose.
    head_dim = C // num_heads
    q = qkv[:, 0 * C:1 * C].reshape(B, H * W, num_heads, head_dim)
    k = qkv[:, 1 * C:2 * C].reshape(B, H * W, num_heads, head_dim)
    v = qkv[:, 2 * C:3 * C].reshape(B, H * W, num_heads, head_dim)
    q_ref = qkv_ref[:, :C].reshape(B, H * W, num_heads, head_dim)
    assert jnp.allclose(q, q_ref, atol=2e-2, rtol=2e-2)
    assert k.shape == v.shape == q.shape

    print("KERNEL_OK")
</pallas_src>

<mosaic_0001>
module attributes {stable_mosaic.version = 11 : i64} {
  func.func @_qkv_kernel(%arg0: i32, %arg1: memref<128x128xbf16, #tpu.memory_space<vmem>>, %arg2: memref<128x384xbf16, #tpu.memory_space<vmem>>, %arg3: memref<1x384xf32, #tpu.memory_space<vmem>>, %arg4: memref<128x384xf32, #tpu.memory_space<vmem>>) attributes {dimension_semantics = [#tpu.dimension_semantics<parallel>], iteration_bounds = array<i64: 1>, scalar_prefetch = 0 : i64, scratch_operands = 0 : i64, tpu.core_type = #tpu.core_type<tc>, window_params = [{transform_indices = @transform_0, window_bounds = array<i64: 128, 128>}, {pipeline_mode = #tpu.pipeline_mode<synchronous>, transform_indices = @transform_1, window_bounds = array<i64: 128, 384>}, {pipeline_mode = #tpu.pipeline_mode<synchronous>, transform_indices = @transform_2, window_bounds = array<i64: 1, 384>}, {transform_indices = @transform_3, window_bounds = array<i64: 128, 384>}]} {
    %c0 = arith.constant 0 : index
    %c0_0 = arith.constant 0 : index
    %0 = vector.load %arg1[%c0, %c0_0] : memref<128x128xbf16, #tpu.memory_space<vmem>>, vector<128x128xbf16>
    %c0_1 = arith.constant 0 : index
    %c0_2 = arith.constant 0 : index
    %1 = vector.load %arg2[%c0_1, %c0_2] : memref<128x384xbf16, #tpu.memory_space<vmem>>, vector<128x384xbf16>
    %cst = arith.constant dense<0.000000e+00> : vector<128x384xf32>
    %2 = tpu.matmul %0, %1, %cst {dimension_numbers = #tpu.dot_dimension_numbers<[1], [0], [0], [1], [0, 0, 1, 1], [], []>} : vector<128x128xbf16>, vector<128x384xbf16>, vector<128x384xf32> -> vector<128x384xf32>
    %c0_3 = arith.constant 0 : index
    %c0_4 = arith.constant 0 : index
    %3 = vector.load %arg3[%c0_3, %c0_4] : memref<1x384xf32, #tpu.memory_space<vmem>>, vector<1x384xf32>
    %4 = vector.broadcast %3 : vector<1x384xf32> to vector<128x384xf32>
    %5 = arith.addf %2, %4 : vector<128x384xf32>
    %c0_5 = arith.constant 0 : index
    %c0_6 = arith.constant 0 : index
    %6 = vector.load %arg4[%c0_5, %c0_6] : memref<128x384xf32, #tpu.memory_space<vmem>>, vector<128x384xf32>
    tpu.vector_store %arg4[%c0_5, %c0_6], %5 {strides = array<i32>} : memref<128x384xf32, #tpu.memory_space<vmem>>, vector<128x384xf32>,
    return
  }
  func.func @transform_0(%arg0: i32) -> (i32, i32) {
    %c0_i32 = arith.constant 0 : i32
    %c0_i32_0 = arith.constant 0 : i32
    return %arg0, %c0_i32 : i32, i32
  }
  func.func @transform_1(%arg0: i32) -> (i32, i32) {
    %c0_i32 = arith.constant 0 : i32
    %c0_i32_0 = arith.constant 0 : i32
    %c0_i32_1 = arith.constant 0 : i32
    return %c0_i32, %c0_i32_0 : i32, i32
  }
  func.func @transform_2(%arg0: i32) -> (i32, i32) {
    %c0_i32 = arith.constant 0 : i32
    %c0_i32_0 = arith.constant 0 : i32
    %c0_i32_1 = arith.constant 0 : i32
    return %c0_i32, %c0_i32_0 : i32, i32
  }
  func.func @transform_3(%arg0: i32) -> (i32, i32) {
    %c0_i32 = arith.constant 0 : i32
    %c0_i32_0 = arith.constant 0 : i32
    return %arg0, %c0_i32 : i32, i32
  }
}

</mosaic_0001>

<bundles_post_ra>
// kernel: bi_level_routing_attention.1
= control target key start
LH: loop header
LB: loop body
LE: loop exit
PB: predicated region body
PF: predicated region fallthrough
CT: control target
= control target key end

     0   :  { %v679_v2 = vmov 0   ;;  %s876_s0 = inlined_call_operand.vmem [shape: bf16[128,128], index: 0, kind: input, shape index: {}]   ;;  %s877_s1 = inlined_call_operand.vmem [shape: bf16[128,384], index: 1, kind: input, shape index: {}]   ;;  %s878_s2 = inlined_call_operand.vmem [shape: f32[1,384], index: 2, kind: input, shape index: {}]   ;;  %s879_s3 = inlined_call_operand.hbm [shape: f32[128,384], index: 3, kind: output, shape index: {}]  }
   0x1   :  { %v615_v0 = vld [vmem:[%s877_s1 + $0x4] ss:$12 sps:$4 sm:$0xff]   ;;  %v617_v1 = vld [vmem:[%s877_s1] ss:$12 sps:$4 sm:$0xff]   ;;  %289 = vmatprep.mubr.bf16.mxu0 %v679_v2  ;;  %v618_v3 = vld [vmem:[%s877_s1 + $0x1c] ss:$12 sps:$4 sm:$0xff]  }
   0x2   :  { %257 = vmatprep.subr.bf16.mxu0 %v615_v0  ;;  %v620_v4 = vld [vmem:[%s877_s1 + $0x18] ss:$12 sps:$4 sm:$0xff]   ;;  %v621_v5 = vld [vmem:[%s877_s1 + $0x34] ss:$12 sps:$4 sm:$0xff]   ;;  %v623_v6 = vld [vmem:[%s877_s1 + $0x30] ss:$12 sps:$4 sm:$0xff]  }
   0x3   :  { %258 = vmatpush1.bf16.msra.mxu0 %v617_v1  ;;  %v624_v7 = vld [vmem:[%s877_s1 + $0x4c] ss:$12 sps:$4 sm:$0xff]   ;;  %v626_v8 = vld [vmem:[%s877_s1 + $0x48] ss:$12 sps:$4 sm:$0xff]   ;;  %v627_v9 = vld [vmem:[%s877_s1 + $0x64] ss:$12 sps:$4 sm:$0xff]  }
   0x4   :  { %259 = vmatprep.subr.bf16.mxu0 %v618_v3  ;;  %v639_v10 = vld [vmem:[%s877_s1 + $0x8] ss:$12 sps:$4 sm:$0xff]   ;;  %v640_v11 = vld [vmem:[%s876_s0] sm:$0xff]   ;;  %v644_v17 = vld [vmem:[%s877_s1 + $0x50] ss:$12 sps:$4 sm:$0xff]  }
   0x5   :  { %579 = vmatprep.subr.bf16.mxu1 %v639_v10  ;;  %v641_v12 = vld [vmem:[%s877_s1 + $0x20] ss:$12 sps:$4 sm:$0xff]   ;;  %595 = vmatprep.mubr.bf16.mxu1 %v640_v11  ;;  %v642_v14 = vld [vmem:[%s877_s1 + $0x38] ss:$12 sps:$4 sm:$0xff]   ;;  %v630_v15 = vld [vmem:[%s877_s1 + $0x7c] ss:$12 sps:$4 sm:$0xff]  }
   0x6   :  { %v629_v13 = vld [vmem:[%s877_s1 + $0x60] ss:$12 sps:$4 sm:$0xff]   ;;  %580 = vmatpush3.bf16.msra.mxu1 %v639_v10  ;;  %v632_v16 = vld [vmem:[%s877_s1 + $0x78] ss:$12 sps:$4 sm:$0xff]   ;;  %v635_v19 = vld [vmem:[%s877_s1 + $0x90] ss:$12 sps:$4 sm:$0xff]  }
   0x7   :  { %260 = vmatpush1.bf16.msra.mxu0 %v620_v4  ;;  %581 = vmatprep.subr.bf16.mxu1 %v641_v12  ;;  %v633_v18 = vld [vmem:[%s877_s1 + $0x94] ss:$12 sps:$4 sm:$0xff]   ;;  %v636_v21 = vld [vmem:[%s877_s1 + $0xac] ss:$12 sps:$4 sm:$0xff]  }
   0x8   :  { %261 = vmatprep.subr.bf16.mxu0 %v621_v5  ;;  %v645_v20 = vld [vmem:[%s877_s1 + $0x68] ss:$12 sps:$4 sm:$0xff]   ;;  %v647_v23 = vld [vmem:[%s877_s1 + $0x80] ss:$12 sps:$4 sm:$0xff]  }
   0x9   :  { %v638_v22 = vld [vmem:[%s877_s1 + $0xa8] ss:$12 sps:$4 sm:$0xff]  }
   0xa   :  { %582 = vmatpush3.bf16.msra.mxu1 %v641_v12 }
   0xb   :  { %262 = vmatpush1.bf16.msra.mxu0 %v623_v6  ;;  %583 = vmatprep.subr.bf16.mxu1 %v642_v14 }
   0xc   :  { %263 = vmatprep.subr.bf16.mxu0 %v624_v7 }
   0xe   :  { %584 = vmatpush3.bf16.msra.mxu1 %v642_v14 }
   0xf   :  { %264 = vmatpush1.bf16.msra.mxu0 %v626_v8  ;;  %585 = vmatprep.subr.bf16.mxu1 %v644_v17 }
  0x10   :  { %265 = vmatprep.subr.bf16.mxu0 %v627_v9 }
  0x12   :  { %586 = vmatpush3.bf16.msra.mxu1 %v644_v17 }
  0x13   :  { %266 = vmatpush1.bf16.msra.mxu0 %v629_v13  ;;  %587 = vmatprep.subr.bf16.mxu1 %v645_v20 }
  0x14   :  { %267 = vmatprep.subr.bf16.mxu0 %v630_v15 }
  0x17   :  { %268 = vmatpush1.bf16.msra.mxu0 %v632_v16 }
  0x18   :  { %269 = vmatprep.subr.bf16.mxu0 %v633_v18 }
  0x1b   :  { %270 = vmatpush1.bf16.msra.mxu0 %v635_v19 }
  0x1c   :  { %8 = vsyncpa [#allocation3], 0  ;;  %271 = vmatprep.subr.bf16.mxu0 %v636_v21  ;;  %588 = vmatpush3.bf16.msra.mxu1 %v645_v20  ;;  %v648_v24 = vld [vmem:[%s877_s1 + $0x98] ss:$12 sps:$4 sm:$0xff]   ;;  %v650_v25 = vld [vmem:[%s877_s1 + $0xb0] ss:$12 sps:$4 sm:$0xff]   ;;  %v66_v33 = vlaneseq }
  0x1d   :  { %589 = vmatprep.subr.bf16.mxu1 %v647_v23  ;;  %v643_v26 = vld [vmem:[%s876_s0 + $0x8] sm:$0xff]   ;;  %v646_v27 = vld [vmem:[%s876_s0 + $0x10] sm:$0xff]   ;;  %v649_v28 = vld [vmem:[%s876_s0 + $0x18] sm:$0xff]  }
  0x1e   :  { %v651_v29 = vld [vmem:[%s876_s0 + $0x20] sm:$0xff]   ;;  %v652_v30 = vld [vmem:[%s876_s0 + $0x28] sm:$0xff]   ;;  %v653_v31 = vld [vmem:[%s876_s0 + $0x30] sm:$0xff]   ;;  %v67_v34 = vshrl.u32 %v66_v33, 7 }
  0x1f   :  { %272 = vmatpush1.bf16.msra.mxu0 %v638_v22  ;;  %v654_v32 = vld [vmem:[%s876_s0 + $0x38] sm:$0xff]   ;;  %v64_v36 = vld [vmem:[%s878_s2] sm:$0x7]  ;;  %s680_s0 = smov [#allocation2]  }
  0x20   :  { %590 = vmatpush3.bf16.msra.mxu1 %v647_v23  ;;  %v68_v35 = vsub.s32 0, %v67_v34  ;;  %v72_v37 = vsub.s32 1, %v67_v34  ;;  %v76_v48 = vsub.s32 2, %v67_v34  ;;  %s520_s2 = sshll.u32 %s680_s0, 4  ;;  %s521_s2 = int_to_ptr.vmem [resolvable:$true] %s520_s2 }
  0x21   :  { %591 = vmatprep.subr.bf16.mxu1 %v648_v24  ;;  %s655_s23 = scalar_lea.vmem %s521_s2, 6144  ;;  %p660_p1 = scmp.lt.s32.totalorder %s521_s2, %s521_s2 }
  0x22   :  { %290 = vmatmul.mubr.bf16.vlgmr.msra.gmra.mrb[0].mxu0 %v640_v11  ;;  %v810_v38 = vrot.slane %v64_v36, %v68_v35  ;;  %v812_v39 = vrot.slane %v64_v36, %v72_v37  ;;  %v818_v50 = vrot.slane %v64_v36, %v76_v48  ;;  %p656_p0 = scmp.ne.s32.totalorder %s521_s2, %s655_s23  ;;  %p661_p2 = scmp.lt.s32.totalorder %s655_s23, %s655_s23 }
  0x23   :  { %299 = vmatprep.mubr.bf16.mxu0 %v679_v2 }
  0x24   :  { %592 = vmatpush3.bf16.msra.mxu1 %v648_v24  ;;  %p662_p3 = por %p661_p2, %p660_p1 }
  0x25   :  { %593 = vmatprep.subr.bf16.mxu1 %v650_v25 }
  0x26   :  { %p663_p4 = pnand %p662_p3, %p656_p0 }
  0x28   :  { %594 = vmatpush3.bf16.msra.mxu1 %v650_v25 }
  0x2a   :  { %300 = vmatmul.mubr.bf16.gmra.mrb[4].mxu0 %v643_v26 }
  0x2b   :  { %309 = vmatprep.mubr.bf16.mxu0 %v679_v2  ;;  %596 = vmatmul.mubr.bf16.vlgmr.msra.gmra.mrb[0].mxu1 %v643_v26 }
  0x2c   :  { %599 = vmatprep.mubr.bf16.mxu1 %v646_v27 }
  0x32   :  { %310 = vmatmul.mubr.bf16.gmra.mrb[8].mxu0 %v646_v27 }
  0x33   :  { %319 = vmatprep.mubr.bf16.mxu0 %v679_v2  ;;  %600 = vmatmul.mubr.bf16.gmra.mrb[4].mxu1 %v649_v28 }
  0x34   :  { %603 = vmatprep.mubr.bf16.mxu1 %v651_v29 }
  0x3a   :  { %320 = vmatmul.mubr.bf16.gmra.mrb[12].mxu0 %v649_v28 }
  0x3b   :  { %329 = vmatprep.mubr.bf16.mxu0 %v679_v2  ;;  %604 = vmatmul.mubr.bf16.gmra.mrb[8].mxu1 %v652_v30 }
  0x3c   :  { %607 = vmatprep.mubr.bf16.mxu1 %v653_v31 }
  0x42   :  { %330 = vmatmul.mubr.bf16.gmra.mrb[16].mxu0 %v651_v29 }
  0x43   :  { %339 = vmatprep.mubr.bf16.mxu0 %v679_v2  ;;  %608 = vmatmul.mubr.bf16.gmra.mrb[12].mxu1 %v654_v32 }
  0x4a   :  { %340 = vmatmul.mubr.bf16.gmra.mrb[20].mxu0 %v652_v30 }
  0x4b   :  { %349 = vmatprep.mubr.bf16.mxu0 %v679_v2 }
  0x52   :  { %350 = vmatmul.mubr.bf16.gmra.mrb[24].mxu0 %v653_v31 }
  0x53   :  { %359 = vmatprep.mubr.bf16.mxu0 %v679_v2 }
  0x5a   :  { %360 = vmatmul.mubr.bf16.gmra.mrb[28].mxu0 %v654_v32 }
  0xf5   :  { %v291_v40 = vpop.f32.mrb[0].mxu0 }
  0xf6   :  { %v292_v41 = vadd.f32 %v291_v40, %v810_v38  ;;  %v293_v42 = vpop.f32.mrb[1].mxu0 }
  0xf7   :  { %v294_v43 = vadd.f32 %v293_v42, %v812_v39  ;;  %v295_v44 = vpop.f32.mrb[2].mxu0 }
  0xf8   :  { %467 = vst [vmem:[#allocation2] sm:$0xff] %v292_v41  ;;  %v296_v45 = vadd.f32 %v295_v44, %v810_v38  ;;  %v297_v46 = vpop.f32.mrb[3].mxu0 }
  0xf9   :  { %468 = vst [vmem:[#allocation2 + $0x8] sm:$0xff] %v294_v43  ;;  %v298_v47 = vadd.f32 %v297_v46, %v812_v39 }
  0xfa   :  { %470 = vst [vmem:[#allocation2 + $0x18] sm:$0xff] %v296_v45 }
  0xfb   :  { %471 = vst [vmem:[#allocation2 + $0x20] sm:$0xff] %v298_v47 }
  0xfd   :  { %v301_v49 = vpop.f32.mrb[4].mxu0 }
  0xfe   :  { %v302_v51 = vadd.f32 %v301_v49, %v810_v38  ;;  %v303_v52 = vpop.f32.mrb[5].mxu0  ;;  %v597_v57 = vpop.f32.mrb[0].mxu1 }
  0xff   :  { %v304_v53 = vadd.f32 %v303_v52, %v812_v39  ;;  %v305_v54 = vpop.f32.mrb[6].mxu0  ;;  %v413_v59 = vadd.f32 %v597_v57, %v818_v50  ;;  %v404_v60 = vpop.f32.mrb[1].mxu1 }
 0x100   :  { %473 = vst [vmem:[#allocation2 + $0x30] sm:$0xff] %v302_v51  ;;  %v306_v55 = vadd.f32 %v305_v54, %v810_v38  ;;  %v307_v56 = vpop.f32.mrb[7].mxu0  ;;  %v405_v61 = vadd.f32 %v404_v60, %v818_v50  ;;  %v598_v62 = vpop.f32.mrb[2].mxu1 }
 0x101   :  { %474 = vst [vmem:[#allocation2 + $0x38] sm:$0xff] %v304_v53  ;;  %v308_v58 = vadd.f32 %v307_v56, %v812_v39  ;;  %475 = vst [vmem:[#allocation2 + $0x40] sm:$0xff] %v413_v59  ;;  %v416_v63 = vadd.f32 %v598_v62, %v818_v50  ;;  %v407_v0 = vpop.f32.mrb[3].mxu1 }
 0x102   :  { %476 = vst [vmem:[#allocation2 + $0x48] sm:$0xff] %v306_v55  ;;  %469 = vst [vmem:[#allocation2 + $0x10] sm:$0xff] %v405_v61  ;;  %v408_v1 = vadd.f32 %v407_v0, %v818_v50 }
 0x103   :  { %477 = vst [vmem:[#allocation2 + $0x50] sm:$0xff] %v308_v58  ;;  %478 = vst [vmem:[#allocation2 + $0x58] sm:$0xff] %v416_v63 }
 0x104   :  { %472 = vst [vmem:[#allocation2 + $0x28] sm:$0xff] %v408_v1 }
 0x105   :  { %v311_v2 = vpop.f32.mrb[8].mxu0 }
 0x106   :  { %v312_v3 = vadd.f32 %v311_v2, %v810_v38  ;;  %v313_v4 = vpop.f32.mrb[9].mxu0  ;;  %v601_v9 = vpop.f32.mrb[4].mxu1 }
 0x107   :  { %v314_v5 = vadd.f32 %v313_v4, %v812_v39  ;;  %v315_v6 = vpop.f32.mrb[10].mxu0  ;;  %v429_v11 = vadd.f32 %v601_v9, %v818_v50  ;;  %v420_v12 = vpop.f32.mrb[5].mxu1 }
 0x108   :  { %479 = vst [vmem:[#allocation2 + $0x60] sm:$0xff] %v312_v3  ;;  %v316_v7 = vadd.f32 %v315_v6, %v810_v38  ;;  %v317_v8 = vpop.f32.mrb[11].mxu0  ;;  %v421_v13 = vadd.f32 %v420_v12, %v818_v50  ;;  %v602_v14 = vpop.f32.mrb[6].mxu1 }
 0x109   :  { %480 = vst [vmem:[#allocation2 + $0x68] sm:$0xff] %v314_v5  ;;  %v318_v10 = vadd.f32 %v317_v8, %v812_v39  ;;  %487 = vst [vmem:[#allocation2 + $0xa0] sm:$0xff] %v429_v11  ;;  %v432_v15 = vadd.f32 %v602_v14, %v818_v50  ;;  %v423_v16 = vpop.f32.mrb[7].mxu1 }
 0x10a   :  { %482 = vst [vmem:[#allocation2 + $0x78] sm:$0xff] %v316_v7  ;;  %481 = vst [vmem:[#allocation2 + $0x70] sm:$0xff] %v421_v13  ;;  %v424_v17 = vadd.f32 %v423_v16, %v818_v50 }
 0x10b   :  { %483 = vst [vmem:[#allocation2 + $0x80] sm:$0xff] %v318_v10  ;;  %490 = vst [vmem:[#allocation2 + $0xb8] sm:$0xff] %v432_v15 }
 0x10c   :  { %484 = vst [vmem:[#allocation2 + $0x88] sm:$0xff] %v424_v17 }
 0x10d   :  { %v321_v18 = vpop.f32.mrb[12].mxu0 }
 0x10e   :  { %v322_v19 = vadd.f32 %v321_v18, %v810_v38  ;;  %v323_v20 = vpop.f32.mrb[13].mxu0  ;;  %v605_v25 = vpop.f32.mrb[8].mxu1 }
 0x10f   :  { %v324_v21 = vadd.f32 %v323_v20, %v812_v39  ;;  %v325_v22 = vpop.f32.mrb[14].mxu0  ;;  %v445_v27 = vadd.f32 %v605_v25, %v818_v50  ;;  %v436_v28 = vpop.f32.mrb[9].mxu1 }
 0x110   :  { %485 = vst [vmem:[#allocation2 + $0x90] sm:$0xff] %v322_v19  ;;  %v326_v23 = vadd.f32 %v325_v22, %v810_v38  ;;  %v327_v24 = vpop.f32.mrb[15].mxu0  ;;  %v437_v29 = vadd.f32 %v436_v28, %v818_v50  ;;  %v606_v30 = vpop.f32.mrb[10].mxu1 }
 0x111   :  { %486 = vst [vmem:[#allocation2 + $0x98] sm:$0xff] %v324_v21  ;;  %v328_v26 = vadd.f32 %v327_v24, %v812_v39  ;;  %499 = vst [vmem:[#allocation2 + $0x100] sm:$0xff] %v445_v27  ;;  %v448_v31 = vadd.f32 %v606_v30, %v818_v50  ;;  %v439_v32 = vpop.f32.mrb[11].mxu1 }
 0x112   :  { %488 = vst [vmem:[#allocation2 + $0xa8] sm:$0xff] %v326_v23  ;;  %493 = vst [vmem:[#allocation2 + $0xd0] sm:$0xff] %v437_v29  ;;  %v440_v33 = vadd.f32 %v439_v32, %v818_v50 }
 0x113   :  { %489 = vst [vmem:[#allocation2 + $0xb0] sm:$0xff] %v328_v26  ;;  %502 = vst [vmem:[#allocation2 + $0x118] sm:$0xff] %v448_v31 }
 0x114   :  { %496 = vst [vmem:[#allocation2 + $0xe8] sm:$0xff] %v440_v33 }
 0x115   :  { %v331_v34 = vpop.f32.mrb[16].mxu0 }
 0x116   :  { %v332_v35 = vadd.f32 %v331_v34, %v810_v38  ;;  %v333_v36 = vpop.f32.mrb[17].mxu0  ;;  %v609_v43 = vpop.f32.mrb[12].mxu1 }
 0x117   :  { %v334_v37 = vadd.f32 %v333_v36, %v812_v39  ;;  %v335_v40 = vpop.f32.mrb[18].mxu0  ;;  %v461_v45 = vadd.f32 %v609_v43, %v818_v50  ;;  %v452_v46 = vpop.f32.mrb[13].mxu1 }
 0x118   :  { %491 = vst [vmem:[#allocation2 + $0xc0] sm:$0xff] %v332_v35  ;;  %v336_v41 = vadd.f32 %v335_v40, %v810_v38  ;;  %v337_v42 = vpop.f32.mrb[19].mxu0  ;;  %v453_v47 = vadd.f32 %v452_v46, %v818_v50  ;;  %v610_v48 = vpop.f32.mrb[14].mxu1 }
 0x119   :  { %492 = vst [vmem:[#allocation2 + $0xc8] sm:$0xff] %v334_v37  ;;  %v338_v44 = vadd.f32 %v337_v42, %v812_v39  ;;  %511 = vst [vmem:[#allocation2 + $0x160] sm:$0xff] %v461_v45  ;;  %v464_v49 = vadd.f32 %v610_v48, %v818_v50  ;;  %v455_v51 = vpop.f32.mrb[15].mxu1 }
 0x11a   :  { %494 = vst [vmem:[#allocation2 + $0xd8] sm:$0xff] %v336_v41  ;;  %505 = vst [vmem:[#allocation2 + $0x130] sm:$0xff] %v453_v47  ;;  %v456_v52 = vadd.f32 %v455_v51, %v818_v50 }
 0x11b   :  { %495 = vst [vmem:[#allocation2 + $0xe0] sm:$0xff] %v338_v44  ;;  %514 = vst [vmem:[#allocation2 + $0x178] sm:$0xff] %v464_v49 }
 0x11c   :  { %508 = vst [vmem:[#allocation2 + $0x148] sm:$0xff] %v456_v52 }
 0x11d   :  { %v341_v53 = vpop.f32.mrb[20].mxu0 }
 0x11e   :  { %v342_v54 = vadd.f32 %v341_v53, %v810_v38  ;;  %v343_v55 = vpop.f32.mrb[21].mxu0 }
 0x11f   :  { %v344_v56 = vadd.f32 %v343_v55, %v812_v39  ;;  %v345_v57 = vpop.f32.mrb[22].mxu0 }
 0x120   :  { %497 = vst [vmem:[#allocation2 + $0xf0] sm:$0xff] %v342_v54  ;;  %v346_v58 = vadd.f32 %v345_v57, %v810_v38  ;;  %v347_v59 = vpop.f32.mrb[23].mxu0 }
 0x121   :  { %498 = vst [vmem:[#allocation2 + $0xf8] sm:$0xff] %v344_v56  ;;  %v348_v60 = vadd.f32 %v347_v59, %v812_v39 }
 0x122   :  { %500 = vst [vmem:[#allocation2 + $0x108] sm:$0xff] %v346_v58 }
 0x123   :  { %501 = vst [vmem:[#allocation2 + $0x110] sm:$0xff] %v348_v60 }
 0x125   :  { %v351_v61 = vpop.f32.mrb[24].mxu0 }
 0x126   :  { %v352_v50 = vadd.f32 %v351_v61, %v810_v38  ;;  %v353_v62 = vpop.f32.mrb[25].mxu0 }
 0x127   :  { %v354_v63 = vadd.f32 %v353_v62, %v812_v39  ;;  %v355_v0 = vpop.f32.mrb[26].mxu0 }
 0x128   :  { %503 = vst [vmem:[#allocation2 + $0x120] sm:$0xff] %v352_v50  ;;  %v356_v1 = vadd.f32 %v355_v0, %v810_v38  ;;  %v357_v2 = vpop.f32.mrb[27].mxu0 }
 0x129   :  { %504 = vst [vmem:[#allocation2 + $0x128] sm:$0xff] %v354_v63  ;;  %v358_v3 = vadd.f32 %v357_v2, %v812_v39 }
 0x12a   :  { %506 = vst [vmem:[#allocation2 + $0x138] sm:$0xff] %v356_v1 }
 0x12b   :  { %507 = vst [vmem:[#allocation2 + $0x140] sm:$0xff] %v358_v3 }
 0x12d   :  { %v361_v4 = vpop.f32.mrb[28].mxu0 }
 0x12e   :  { %v362_v5 = vadd.f32 %v361_v4, %v810_v38  ;;  %v363_v6 = vpop.f32.mrb[29].mxu0 }
 0x12f   :  { %v364_v7 = vadd.f32 %v363_v6, %v812_v39  ;;  %v365_v8 = vpop.f32.mrb[30].mxu0 }
 0x130   :  { %509 = vst [vmem:[#allocation2 + $0x150] sm:$0xff] %v362_v5  ;;  %v366_v9 = vadd.f32 %v365_v8, %v810_v38  ;;  %v367_v10 = vpop.f32.mrb[31].mxu0 }
 0x131   :  { %510 = vst [vmem:[#allocation2 + $0x158] sm:$0xff] %v364_v7  ;;  %v368_v11 = vadd.f32 %v367_v10, %v812_v39 }
 0x132   :  { %512 = vst [vmem:[#allocation2 + $0x168] sm:$0xff] %v366_v9 }
 0x133   :  { %513 = vst [vmem:[#allocation2 + $0x170] sm:$0xff] %v368_v11 }
 0x134   :  { %666 = shalt.err (!%p663_p4)
}
 0x135   :  { %s667_s26 = scalar_lea.hbm %s879_s3, 6144 }
 0x136   :  { %p668_p5 = scmp.ne.s32.totalorder %s879_s3, %s667_s26  ;;  %p671_p6 = scmp.lt.u32.totalorder %s667_s26, %s879_s3 }
 0x138   :  { %p673_p7 = pnand %p671_p6, %p668_p5 }
 0x13a   :  { %676 = shalt.err (!%p673_p7)
}
 0x13b   :  { %s681_s4 = smov 384   ;;  %s682_s5 = smov 24  }
 0x13c   :  { %526 = dma.vmem_to_hbm [thread:$0]  %s521_s2, 6144, %s879_s3, [#allocation3], %s681_s4, %s681_s4, %s682_s5  }
 0x13d   :  { %677 = dma.done.wait [#allocation3], 6144  }
 0x13e   :  { %678 = vsyncadd [#allocation3], 4294961152 }
 0x13f   :  { %530 = vsyncpa [#allocation3], 1 }

</bundles_post_ra>
